<compile_context>
chip_gen: v6e
topology: v6e:2x2x1
jax: 0.10.0
libtpu: 0.0.40
codegen_flags: <defaults>
</compile_context>

<pallas_src>
import math
import functools

import jax
import jax.numpy as jnp
from jax.experimental import pallas as pl
from jax.experimental.pallas import tpu as pltpu


# -------------------------- Fused Pallas kernel ----------------------------

def _make_mlp_kernel(num_hidden, out_is_scalar):
    """Build a fused MLP kernel body.

    Ref layout: (x_ref, w1, b1, w2, b2, ..., wL, bL, w_out, o_ref)
      * hidden weights are (in, out), biases are (1, out)
      * if out_is_scalar, w_out is (1, n_last) (row vector, PyTorch layout);
        otherwise w_out is (n_last, out_size).
    """

    def kernel(*refs):
        x_ref = refs[0]
        o_ref = refs[-1]
        params = refs[1:-1]

        h = x_ref[...]
        for i in range(num_hidden):
            w = params[2 * i][...]        # (in, out)
            b = params[2 * i + 1][...]    # (1, out) -> broadcasts over batch
            h = jnp.dot(h, w, preferred_element_type=jnp.float32) + b
            h = jnp.maximum(h, 0.0)       # ReLU on the VPU

        w_out = params[-1][...]
        if out_is_scalar:
            # (B, n_last) * (1, n_last) on the VPU, then an XLU lane-reduce.
            # Avoids burning an MXU push/pop on a 1-wide matmul.
            y = jnp.sum(h * w_out, axis=-1, keepdims=True)
        else:
            y = jnp.dot(h, w_out, preferred_element_type=jnp.float32)

        o_ref[...] = y.astype(o_ref.dtype)

    return kernel


def _round_up(x, m):
    return ((x + m - 1) // m) * m


def fused_mlp_forward(x, hidden_params_k, w_out_k, out_size, block_b=512):
    """x: (B, d) f32.  hidden_params_k: list of (w_t(in,out), b(1,out)).
    w_out_k: (1, n_last) if out_size == 1 else (n_last, out_size)."""
    B, d = x.shape
    num_hidden = len(hidden_params_k)
    out_is_scalar = (out_size == 1)

    # Batch tiling:
    #  * small batch  -> one sublane-padded tile (bb == padded B)
    #  * large batch  -> fixed 512-row tiles, batch padded up to a multiple,
    #    grid axis marked "parallel" (megacore sharding + DMA pipelining).
    if B <= block_b:
        bb = _round_up(max(B, 1), 8)
    else:
        bb = block_b
    B_pad = _round_up(B, bb)
    x_in = x if B_pad == B else jnp.pad(x, ((0, B_pad - B), (0, 0)))
    nb = B_pad // bb

    flat_params = []
    in_specs = [pl.BlockSpec((bb, d), lambda i: (i, 0))]
    for (w_t, b) in hidden_params_k:
        # Constant index_map: weights/biases stay resident across batch tiles.
        in_specs.append(pl.BlockSpec(w_t.shape, lambda i: (0, 0)))
        in_specs.append(pl.BlockSpec(b.shape, lambda i: (0, 0)))
        flat_params.extend([w_t, b])
    in_specs.append(pl.BlockSpec(w_out_k.shape, lambda i: (0, 0)))
    flat_params.append(w_out_k)

    out_spec = pl.BlockSpec((bb, out_size), lambda i: (i, 0))

    out = pl.pallas_call(
        _make_mlp_kernel(num_hidden, out_is_scalar),
        out_shape=jax.ShapeDtypeStruct((B_pad, out_size), x.dtype),
        grid=(nb,),
        in_specs=in_specs,
        out_specs=out_spec,
        compiler_params=pltpu.CompilerParams(
            dimension_semantics=("parallel",)),
    )(x_in, *flat_params)

    if B_pad != B:
        out = out[:B]
    return out


# -------------------------- Parameter init ---------------------------------

def kaiming_normal(key, fan_out, fan_in, a=math.sqrt(5), dtype=jnp.float32):
    # PyTorch kaiming_normal_ (leaky_relu nonlinearity, mode=fan_in):
    #   gain = sqrt(2 / (1 + a^2)), std = gain / sqrt(fan_in)
    gain = math.sqrt(2.0 / (1.0 + a * a))
    std = gain / math.sqrt(fan_in)
    return jax.random.normal(key, (fan_out, fan_in), dtype=dtype) * std


def linear_bias_init(key, fan_in, fan_out, dtype=jnp.float32):
    # PyTorch nn.Linear default bias init: U(-1/sqrt(fan_in), 1/sqrt(fan_in))
    bound = 1.0 / math.sqrt(fan_in)
    return jax.random.uniform(key, (fan_out,), dtype=dtype,
                              minval=-bound, maxval=bound)


def init_net_params(key, d, n_sizes, out_size=1):
    """Mirror Net.__init__ (PyTorch layouts: weight (out, in), bias (out,))."""
    sizes = [d] + list(n_sizes)
    hidden = []
    for i in range(len(sizes) - 1):
        key, kw, kb = jax.random.split(key, 3)
        w = kaiming_normal(kw, sizes[i + 1], sizes[i])          # (out, in)
        b = linear_bias_init(kb, sizes[i], sizes[i + 1])        # (out,)
        hidden.append((w, b))
    key, kw = jax.random.split(key)
    w_out = kaiming_normal(kw, out_size, sizes[-1])             # (out_size, n_last)
    return hidden, w_out


def prepare_kernel_params(hidden, w_out, out_size):
    """One-time layout prep (hoisted out of the forward pass):
    hidden weights -> (in, out), biases -> (1, out);
    w_out kept as (1, n_last) for the VPU+reduce path when out_size == 1,
    else transposed to (n_last, out_size) for an MXU matmul."""
    hidden_k = [(jnp.transpose(w), b.reshape(1, -1)) for (w, b) in hidden]
    if out_size == 1:
        w_out_k = w_out                      # (1, n_last)
    else:
        w_out_k = jnp.transpose(w_out)       # (n_last, out_size)
    return hidden_k, w_out_k


# -------------------------- Forward (wrapper) -------------------------------

@functools.partial(jax.jit, static_argnames=("out_size",))
def net_forward(x, hidden_params_k, w_out_k, out_size):
    return fused_mlp_forward(x, hidden_params_k, w_out_k, out_size)


# ------------------------------ Main ----------------------------------------

if __name__ == "__main__":
    key = jax.random.PRNGKey(0)

    # Small shapes consistent with the module: d input features, two hidden
    # layers, scalar output per sample.
    batch = 8
    d = 16
    n_sizes = [32, 32]
    out_size = 1

    key, kx, kp = jax.random.split(key, 3)
    x = jax.random.normal(kx, (batch, d), dtype=jnp.float32)

    hidden_params, w_out = init_net_params(kp, d, n_sizes, out_size)
    hidden_params_k, w_out_k = prepare_kernel_params(hidden_params, w_out,
                                                     out_size)

    y = net_forward(x, hidden_params_k, w_out_k, out_size)
    jax.block_until_ready(y)

    assert y.shape == (batch, out_size), y.shape
    assert y.dtype == jnp.float32, y.dtype

    # Pure-JAX reference (original PyTorch layouts) to check the fused kernel.
    def ref_forward(x, hidden_params, w_out):
        for (w, b) in hidden_params:
            x = jnp.maximum(x @ w.T + b, 0.0)
        return x @ w_out.T

    y_ref = ref_forward(x, hidden_params, w_out)
    assert jnp.allclose(y, y_ref, atol=1e-5, rtol=1e-5)

    # Also exercise the tiled/padded path (B > 512, non-multiple of 8).
    key, kx2 = jax.random.split(key)
    x_big = jax.random.normal(kx2, (1037, d), dtype=jnp.float32)
    y_big = net_forward(x_big, hidden_params_k, w_out_k, out_size)
    jax.block_until_ready(y_big)
    y_big_ref = ref_forward(x_big, hidden_params, w_out)
    assert y_big.shape == (1037, out_size), y_big.shape
    assert jnp.allclose(y_big, y_big_ref, atol=1e-5, rtol=1e-5)

    print("KERNEL_OK")
</pallas_src>

<mosaic_0001>
module attributes {stable_mosaic.version = 11 : i64} {
  func.func @kernel(%arg0: i32, %arg1: memref<8x16xf32, #tpu.memory_space<vmem>>, %arg2: memref<16x32xf32, #tpu.memory_space<vmem>>, %arg3: memref<1x32xf32, #tpu.memory_space<vmem>>, %arg4: memref<32x32xf32, #tpu.memory_space<vmem>>, %arg5: memref<1x32xf32, #tpu.memory_space<vmem>>, %arg6: memref<1x32xf32, #tpu.memory_space<vmem>>, %arg7: memref<8x1xf32, #tpu.memory_space<vmem>>) attributes {dimension_semantics = [#tpu.dimension_semantics<parallel>], iteration_bounds = array<i64: 1>, scalar_prefetch = 0 : i64, scratch_operands = 0 : i64, tpu.core_type = #tpu.core_type<tc>, window_params = [{transform_indices = @transform_0, window_bounds = array<i64: 8, 16>}, {pipeline_mode = #tpu.pipeline_mode<synchronous>, transform_indices = @transform_1, window_bounds = array<i64: 16, 32>}, {pipeline_mode = #tpu.pipeline_mode<synchronous>, transform_indices = @transform_2, window_bounds = array<i64: 1, 32>}, {pipeline_mode = #tpu.pipeline_mode<synchronous>, transform_indices = @transform_3, window_bounds = array<i64: 32, 32>}, {pipeline_mode = #tpu.pipeline_mode<synchronous>, transform_indices = @transform_4, window_bounds = array<i64: 1, 32>}, {pipeline_mode = #tpu.pipeline_mode<synchronous>, transform_indices = @transform_5, window_bounds = array<i64: 1, 32>}, {transform_indices = @transform_6, window_bounds = array<i64: 8, 1>}]} {
    %c0 = arith.constant 0 : index
    %c0_0 = arith.constant 0 : index
    %0 = vector.load %arg1[%c0, %c0_0] : memref<8x16xf32, #tpu.memory_space<vmem>>, vector<8x16xf32>
    %c0_1 = arith.constant 0 : index
    %c0_2 = arith.constant 0 : index
    %1 = vector.load %arg2[%c0_1, %c0_2] : memref<16x32xf32, #tpu.memory_space<vmem>>, vector<16x32xf32>
    %c0_3 = arith.constant 0 : index
    %c0_4 = arith.constant 0 : index
    %2 = vector.load %arg3[%c0_3, %c0_4] : memref<1x32xf32, #tpu.memory_space<vmem>>, vector<1x32xf32>
    %cst = arith.constant dense<0.000000e+00> : vector<8x32xf32>
    %3 = tpu.matmul %0, %1, %cst {dimension_numbers = #tpu.dot_dimension_numbers<[1], [0], [0], [1], [0, 0, 1, 1], [], []>} : vector<8x16xf32>, vector<16x32xf32>, vector<8x32xf32> -> vector<8x32xf32>
    %4 = vector.broadcast %2 : vector<1x32xf32> to vector<8x32xf32>
    %5 = arith.addf %3, %4 : vector<8x32xf32>
    %cst_5 = arith.constant 0.000000e+00 : f32
    %6 = vector.broadcast %cst_5 : f32 to vector<8x32xf32>
    %7 = arith.maximumf %5, %6 : vector<8x32xf32>
    %c0_6 = arith.constant 0 : index
    %c0_7 = arith.constant 0 : index
    %8 = vector.load %arg4[%c0_6, %c0_7] : memref<32x32xf32, #tpu.memory_space<vmem>>, vector<32x32xf32>
    %c0_8 = arith.constant 0 : index
    %c0_9 = arith.constant 0 : index
    %9 = vector.load %arg5[%c0_8, %c0_9] : memref<1x32xf32, #tpu.memory_space<vmem>>, vector<1x32xf32>
    %cst_10 = arith.constant dense<0.000000e+00> : vector<8x32xf32>
    %10 = tpu.matmul %7, %8, %cst_10 {dimension_numbers = #tpu.dot_dimension_numbers<[1], [0], [0], [1], [0, 0, 1, 1], [], []>} : vector<8x32xf32>, vector<32x32xf32>, vector<8x32xf32> -> vector<8x32xf32>
    %11 = vector.broadcast %9 : vector<1x32xf32> to vector<8x32xf32>
    %12 = arith.addf %10, %11 : vector<8x32xf32>
    %cst_11 = arith.constant 0.000000e+00 : f32
    %13 = vector.broadcast %cst_11 : f32 to vector<8x32xf32>
    %14 = arith.maximumf %12, %13 : vector<8x32xf32>
    %c0_12 = arith.constant 0 : index
    %c0_13 = arith.constant 0 : index
    %15 = vector.load %arg6[%c0_12, %c0_13] : memref<1x32xf32, #tpu.memory_space<vmem>>, vector<1x32xf32>
    %16 = vector.broadcast %15 : vector<1x32xf32> to vector<8x32xf32>
    %17 = arith.mulf %14, %16 : vector<8x32xf32>
    %cst_14 = arith.constant dense<0.000000e+00> : vector<8xf32>
    %18 = vector.multi_reduction <add>, %17, %cst_14 [1] : vector<8x32xf32> to vector<8xf32>
    %19 = vector.shape_cast %18 : vector<8xf32> to vector<8x1xf32>
    %c0_15 = arith.constant 0 : index
    %c0_16 = arith.constant 0 : index
    %20 = vector.load %arg7[%c0_15, %c0_16] : memref<8x1xf32, #tpu.memory_space<vmem>>, vector<8x1xf32>
    tpu.vector_store %arg7[%c0_15, %c0_16], %19 {strides = array<i32>} : memref<8x1xf32, #tpu.memory_space<vmem>>, vector<8x1xf32>,
    return
  }
  func.func @transform_0(%arg0: i32) -> (i32, i32) {
    %c0_i32 = arith.constant 0 : i32
    %c0_i32_0 = arith.constant 0 : i32
    return %arg0, %c0_i32 : i32, i32
  }
  func.func @transform_1(%arg0: i32) -> (i32, i32) {
    %c0_i32 = arith.constant 0 : i32
    %c0_i32_0 = arith.constant 0 : i32
    %c0_i32_1 = arith.constant 0 : i32
    return %c0_i32, %c0_i32_0 : i32, i32
  }
  func.func @transform_2(%arg0: i32) -> (i32, i32) {
    %c0_i32 = arith.constant 0 : i32
    %c0_i32_0 = arith.constant 0 : i32
    %c0_i32_1 = arith.constant 0 : i32
    return %c0_i32, %c0_i32_0 : i32, i32
  }
  func.func @transform_3(%arg0: i32) -> (i32, i32) {
    %c0_i32 = arith.constant 0 : i32
    %c0_i32_0 = arith.constant 0 : i32
    %c0_i32_1 = arith.constant 0 : i32
    return %c0_i32, %c0_i32_0 : i32, i32
  }
  func.func @transform_4(%arg0: i32) -> (i32, i32) {
    %c0_i32 = arith.constant 0 : i32
    %c0_i32_0 = arith.constant 0 : i32
    %c0_i32_1 = arith.constant 0 : i32
    return %c0_i32, %c0_i32_0 : i32, i32
  }
  func.func @transform_5(%arg0: i32) -> (i32, i32) {
    %c0_i32 = arith.constant 0 : i32
    %c0_i32_0 = arith.constant 0 : i32
    %c0_i32_1 = arith.constant 0 : i32
    return %c0_i32, %c0_i32_0 : i32, i32
  }
  func.func @transform_6(%arg0: i32) -> (i32, i32) {
    %c0_i32 = arith.constant 0 : i32
    %c0_i32_0 = arith.constant 0 : i32
    return %arg0, %c0_i32 : i32, i32
  }
}

</mosaic_0001>

<bundles_post_ra>
// kernel: net_forward.1
= control target key start
LH: loop header
LB: loop body
LE: loop exit
PB: predicated region body
PF: predicated region fallthrough
CT: control target
= control target key end

     0   :  { %11 = vsyncpa [#allocation3], 0  ;;  %s417_s0 = inlined_call_operand.hbm [shape: f32[8,16], index: 0, kind: input, shape index: {}]   ;;  %s418_s1 = inlined_call_operand.hbm [shape: f32[16,32], index: 1, kind: input, shape index: {}]   ;;  %s419_s2 = inlined_call_operand.vmem [shape: f32[1,32], index: 2, kind: input, shape index: {}]   ;;  %s420_s3 = inlined_call_operand.hbm [shape: f32[32,32], index: 3, kind: input, shape index: {}]   ;;  %s421_s4 = inlined_call_operand.vmem [shape: f32[1,32], index: 4, kind: input, shape index: {}]   ;;  %s422_s5 = inlined_call_operand.vmem [shape: f32[1,32], index: 5, kind: input, shape index: {}]   ;;  %s423_s6 = inlined_call_operand.vmem [shape: f32[8,1], index: 6, kind: output, shape index: {}]  }
   0x1   :  { %12 = vsyncpa [#allocation5], 0  ;;  %s354_s21 = smov [#allocation4]  }
   0x2   :  { %s28_s22 = sshll.u32 %s354_s21, 4  ;;  %s29_s22 = int_to_ptr.vmem [resolvable:$true] %s28_s22 }
   0x3   :  { %s298_s23 = scalar_lea.vmem %s29_s22, 256  ;;  %p303_p1 = scmp.lt.s32.totalorder %s29_s22, %s29_s22 }
   0x4   :  { %p299_p0 = scmp.ne.s32.totalorder %s29_s22, %s298_s23  ;;  %p304_p2 = scmp.lt.s32.totalorder %s298_s23, %s298_s23 }
   0x6   :  { %p305_p3 = por %p304_p2, %p303_p1 }
   0x8   :  { %p306_p4 = pnand %p305_p3, %p299_p0 }
   0xa   :  { %309 = shalt.err (!%p306_p4)
}
   0xb   :  { %s355_s24 = smov 128   ;;  %s356_s25 = smov 8  }
   0xc   :  { %34 = dma.hbm_to_vmem [thread:$0]  %s418_s1, 256, %s29_s22, [#allocation5], %s355_s24, %s355_s24, %s356_s25  }
   0xd   :  { %s357_s28 = smov [#allocation2]   ;;  %s358_s30 = smov [#allocation6]  }
   0xe   :  { %s19_s29 = sshll.u32 %s357_s28, 4  ;;  %s42_s7 = sshll.u32 %s358_s30, 4  ;;  %s20_s29 = int_to_ptr.vmem [resolvable:$true] %s19_s29  ;;  %s43_s7 = int_to_ptr.vmem [resolvable:$true] %s42_s7 }
   0xf   :  { %s318_s8 = scalar_lea.vmem %s20_s29, 128  ;;  %p323_p6 = scmp.lt.s32.totalorder %s20_s29, %s20_s29 }
  0x10   :  { %p319_p5 = scmp.ne.s32.totalorder %s20_s29, %s318_s8  ;;  %p324_p7 = scmp.lt.s32.totalorder %s318_s8, %s318_s8 }
  0x12   :  { %p325_p8 = por %p324_p7, %p323_p6 }
  0x14   :  { %p326_p9 = pnand %p325_p8, %p319_p5 }
  0x16   :  { %329 = shalt.err (!%p326_p9)
}
  0x17   :  { %22 = dma.hbm_to_vmem [thread:$0]  %s417_s0, 128, %s20_s29, [#allocation3]  }
  0x18   :  { %s338_s11 = scalar_lea.vmem %s43_s7, 512  ;;  %p343_p11 = scmp.lt.s32.totalorder %s43_s7, %s43_s7 }
  0x19   :  { %p339_p10 = scmp.ne.s32.totalorder %s43_s7, %s338_s11  ;;  %p344_p12 = scmp.lt.s32.totalorder %s338_s11, %s338_s11 }
  0x1b   :  { %p345_p13 = por %p344_p12, %p343_p11 }
  0x1d   :  { %p346_p0 = pnand %p345_p13, %p339_p10 }
  0x1f   :  { %349 = shalt.err (!%p346_p0)
}
  0x20   :  { %48 = dma.hbm_to_vmem [thread:$0]  %s420_s3, 512, %s43_s7, [#allocation5], %s355_s24, %s355_s24, %s356_s25  }
  0x21   :  { %350 = dma.done.wait [#allocation3], 128  }
  0x22   :  { %351 = vsyncadd [#allocation3], 4294967168 }
  0x23   :  { %352 = dma.done.wait [#allocation5], 768  }
  0x24   :  { %353 = vsyncadd [#allocation5], 4294966528  ;;  %v359_v0 = vmov 0.0   ;;  %vm360_vm0 = vmmov 0   ;;  %v64_v1 = vld [vmem:[#allocation4 + $0x8] sm:$0xff]  ;;  %v63_v2 = vld [vmem:[#allocation4] sm:$0xff] }
  0x25   :  { %265 = vmatprep.subr.mxu0 %v359_v0  ;;  %269 = vmatprep.mubr.msk.f32.mxu0 %vm360_vm0, %v359_v0  ;;  %v62_v3 = vld [vmem:[#allocation2] sm:$0xff]  ;;  %vm72_vm1 = vcmask 130048   ;;  %v150_v4 = vld [vmem:[#allocation6 + $0x18] sm:$0xff]  ;;  %v149_v5 = vld [vmem:[#allocation6 + $0x10] sm:$0xff]  ;;  %vm158_vm2 = vcmask 261120   ;;  %vm244_vm3 = vcmask 7168  }
  0x26   :  { %272 = vmatprep.subr.mxu1 %v359_v0  ;;  %280 = vmatprep.mubr.msk.f32.mxu1 %vm360_vm0, %v359_v0  ;;  %v148_v6 = vld [vmem:[#allocation6 + $0x8] sm:$0xff]  ;;  %v147_v7 = vld [vmem:[#allocation6] sm:$0xff] }
  0x27   :  { %266 = vmatpush3.msra.mxu0 %v64_v1  ;;  %273 = vmatpush3.msra.mxu1 %v150_v4  ;;  %v252_v8 = vld [vmem:[%s419_s2] ss:$0 sm:$0xff] }
  0x28   :  { %267 = vmatprep.subr.mxu0 %v359_v0  ;;  %274 = vmatprep.subr.mxu1 %v359_v0  ;;  %v254_v13 = vld [vmem:[%s421_s4] ss:$0 sm:$0xff] }
  0x29   :  { %268 = vmatpush3.msra.mxu0 %v63_v2  ;;  %275 = vmatpush3.msra.mxu1 %v149_v5  ;;  %v256_v17 = vld [vmem:[%s422_s5] ss:$0 sm:$0xff] }
  0x2a   :  { %270 = vmatmul.mubr.msk.f32.vlgmr.msra.gmra.mxu0 %vm72_vm1, %v62_v3  ;;  %276 = vmatprep.subr.mxu1 %v359_v0 }
  0x2b   :  { %277 = vmatpush3.msra.mxu1 %v148_v6 }
  0x2c   :  { %278 = vmatprep.subr.mxu1 %v359_v0 }
  0x2d   :  { %279 = vmatpush3.msra.mxu1 %v147_v7 }
  0xea   :  { %v142_v9 = vpop.f32.mrf.mxu0 }
  0xeb   :  { %v143_v10 = vadd.f32 %v252_v8, %v142_v9 }
  0xec   :  { %v271_v11 = vpop.f32.mrf.mxu0 }
  0xed   :  { %v146_v12 = vmax.f32 %v143_v10, 0.0 }
  0xef   :  { %281 = vmatmul.mubr.msk.f32.vlgmr.msra.gmra.mxu1 %vm158_vm2, %v146_v12 }
 0x1af   :  { %v228_v14 = vpop.f32.mrf.mxu1 }
 0x1b0   :  { %v229_v15 = vadd.f32 %v254_v13, %v228_v14 }
 0x1b1   :  { %v282_v16 = vpop.f32.mrf.mxu1 }
 0x1b2   :  { %v232_v18 = vmax.f32 %v229_v15, 0.0 }
 0x1b4   :  { %v240_v19 = vmul.f32 %v256_v17, %v232_v18 }
 0x1b6   :  { %v241_v20 = vsel %vm158_vm2, %v240_v19, 0.0 }
 0x1b7   :  { %242 = vadd.xlane.f32.xlu0 %v241_v20 }
 0x240   :  { %v243_v21 = vpop.xlane.xlu0 %242 }
 0x241   :  { %245 = vst.msk [vmem:[%s423_s6] sm:$0xff] %vm244_vm3, %v243_v21 }
 0x242   :  { %250 = vsyncpa [#allocation3], 1 }
 0x243   :  { %251 = vsyncpa [#allocation5], 1 }

</bundles_post_ra>
